<compile_context>
chip_gen: v7x
topology: tpu7x:2x2x1
jax: 0.10.0
libtpu: 0.0.40
codegen_flags: <defaults>
</compile_context>

<pallas_src>
import jax
import jax.numpy as jnp
from jax.experimental import pallas as pl
from jax.experimental.pallas import tpu as pltpu

# Stands in for the module-level `global_cluster` that the PyTorch code sets from
# the kmeans prediction on the dense path.
GLOBAL_CLUSTER = 1


def _round_up(a: int, b: int) -> int:
    return (a + b - 1) // b * b


# ----------------------------------------------------------------------------
# Kernels
# ----------------------------------------------------------------------------
def _linear_kernel_single(x_ref, w_ref, b_ref, o_ref):
    # Whole K axis in one tile: no accumulator scratch, no zero-init.
    o_ref[...] = (
        jnp.dot(x_ref[...], w_ref[...], preferred_element_type=jnp.float32)
        + b_ref[...]
    ).astype(o_ref.dtype)


def _linear_kernel_acc(x_ref, w_ref, b_ref, o_ref, acc_ref):
    # x_ref : (tm, tk)   activation tile
    # w_ref : (tk, tn)   weight tile in pre-transposed (in, out) layout
    # b_ref : (1, tn)    f32 bias row tile
    # o_ref : (tm, tn)   output tile
    # acc_ref: (tm, tn)  f32 accumulator (persists across the K grid axis)
    k = pl.program_id(2)

    @pl.when(k == 0)
    def _():
        acc_ref[...] = jnp.zeros_like(acc_ref)

    acc_ref[...] += jnp.dot(
        x_ref[...], w_ref[...], preferred_element_type=jnp.float32
    )

    @pl.when(k == pl.num_programs(2) - 1)
    def _():
        o_ref[...] = (acc_ref[...] + b_ref[...]).astype(o_ref.dtype)


# ----------------------------------------------------------------------------
# Static parameter preparation (done once; NOT in the hot path)
# ----------------------------------------------------------------------------
class LinearParams:
    """Pre-transposed (K, N) weight, pre-padded to tile multiples, f32 bias row.

    Hoists every per-call pad / cast / transpose out of pallas_linear so the
    bandwidth-bound GEMV path touches the weight exactly once per call.
    """

    def __init__(self, weight, bias, *, tn_max=512, tk_max=1024):
        N, K = weight.shape  # native nn.Linear layout: (out_features, in_features)

        # N tile: full-axis when small (block == full dim is exempt from the 128
        # rule). For larger N pick a multiple of 128 with >= 2 blocks so both
        # v7x TensorCores get j-axis work even when M has a single block.
        if N <= 256:
            tn = N
        else:
            half = -(-N // 2)  # ceil(N / 2)
            tn = max(128, min(tn_max, (half // 128) * 128))

        # K tile: full-axis when it fits a tile, otherwise tk_max (multiple of 128).
        tk = K if K <= tk_max else tk_max

        Np = _round_up(N, tn)
        Kp = _round_up(K, tk)

        # One-time transpose to (K, N): canonical NN matmul in the kernel, no
        # per-tile XLU relayout of the weight.
        w_kn = weight.T
        if (Kp, Np) != (K, N):
            w_kn = jnp.pad(w_kn, ((0, Kp - K), (0, Np - N)))
        b_row = jnp.pad(bias.astype(jnp.float32), (0, Np - N)).reshape(1, Np)

        self.w_kn = w_kn
        self.b_row = b_row
        self.N, self.K = N, K
        self.Np, self.Kp = Np, Kp
        self.tn, self.tk = tn, tk


# ----------------------------------------------------------------------------
# y = x @ weight.T + bias  (weight/bias pre-prepared in LinearParams)
# ----------------------------------------------------------------------------
def pallas_linear(x, p: LinearParams, *, tm_max=256, vmem_limit_bytes=48 * 1024 * 1024):
    M, K = x.shape
    assert K == p.K, f"feature mismatch: x has {K}, weight expects {p.K}"
    out_dtype = x.dtype

    # Sublane multiple depends on dtype packing: f32->8, bf16->16, int8->32.
    sub = max(8, 32 // jnp.dtype(out_dtype).itemsize)
    tm = min(tm_max, _round_up(M, sub))
    Mp = _round_up(M, tm)

    # Only the (cheap, activation-sized) x padding remains per-call.
    if (Mp, p.Kp) != (M, K):
        x = jnp.pad(x, ((0, Mp - M), (0, p.Kp - K)))

    n_k = p.Kp // p.tk
    itemsize = jnp.dtype(out_dtype).itemsize
    cost = pl.CostEstimate(
        flops=2 * Mp * p.Np * p.Kp,
        transcendentals=0,
        bytes_accessed=(
            Mp * p.Kp * x.dtype.itemsize
            + p.Kp * p.Np * p.w_kn.dtype.itemsize
            + p.Np * 4
            + Mp * p.Np * itemsize
        ),
    )

    if n_k == 1:
        # Single K step: no accumulator scratch, 2-D grid.
        out = pl.pallas_call(
            _linear_kernel_single,
            out_shape=jax.ShapeDtypeStruct((Mp, p.Np), out_dtype),
            grid_spec=pltpu.PrefetchScalarGridSpec(
                num_scalar_prefetch=0,
                grid=(Mp // tm, p.Np // p.tn),
                in_specs=[
                    pl.BlockSpec((tm, p.Kp), lambda i, j: (i, 0)),     # x
                    pl.BlockSpec((p.Kp, p.tn), lambda i, j: (0, j)),   # weight (K, N)
                    pl.BlockSpec((1, p.tn), lambda i, j: (0, j)),      # bias row
                ],
                out_specs=pl.BlockSpec((tm, p.tn), lambda i, j: (i, j)),
            ),
            compiler_params=pltpu.CompilerParams(
                dimension_semantics=("parallel", "parallel"),
                vmem_limit_bytes=vmem_limit_bytes,
            ),
            cost_estimate=cost,
        )(x, p.w_kn, p.b_row)
    else:
        out = pl.pallas_call(
            _linear_kernel_acc,
            out_shape=jax.ShapeDtypeStruct((Mp, p.Np), out_dtype),
            grid_spec=pltpu.PrefetchScalarGridSpec(
                num_scalar_prefetch=0,
                grid=(Mp // tm, p.Np // p.tn, n_k),
                in_specs=[
                    pl.BlockSpec((tm, p.tk), lambda i, j, k: (i, k)),     # x
                    pl.BlockSpec((p.tk, p.tn), lambda i, j, k: (k, j)),   # weight (K, N)
                    pl.BlockSpec((1, p.tn), lambda i, j, k: (0, j)),      # bias row
                ],
                out_specs=pl.BlockSpec((tm, p.tn), lambda i, j, k: (i, j)),
                scratch_shapes=[pltpu.VMEM((tm, p.tn), jnp.float32)],
            ),
            compiler_params=pltpu.CompilerParams(
                dimension_semantics=("parallel", "parallel", "arbitrary"),
                vmem_limit_bytes=vmem_limit_bytes,
            ),
            cost_estimate=cost,
        )(x, p.w_kn, p.b_row)

    if (Mp, p.Np) != (M, p.N):
        out = out[:M, : p.N]
    return out


# ----------------------------------------------------------------------------
# ReduceLayer wrapper (state-carrying; matmuls run in Pallas)
# ----------------------------------------------------------------------------
class ReduceLayer:
    def __init__(self, weight, bias, act_list, sparsity):
        # weight: (out_features, in_features); bias: (out_features,)
        self.weight = weight          # kept in native layout for the row gather
        self.bias = bias
        out_features = weight.shape[0]
        self.remained_neurons = int(out_features * sparsity)
        # per-cluster orderings of OUTPUT neurons, truncated like the torch code
        self.act_list = [
            jnp.asarray(a[: self.remained_neurons], dtype=jnp.int32) for a in act_list
        ]
        # Static dense params: transpose / pad / f32-cast done exactly once.
        self.dense_params = LinearParams(weight, bias)
        self.weight_updated = False
        self._filtered_params = None
        self._filtered_cluster = None

    def __call__(self, x):
        if x.shape[0] > 1:
            # dense path: full linear
            self.weight_updated = False
            y = pallas_linear(x, self.dense_params)
            # TODO(synk): the num==25 branch (get_core_neurons + mlb.transform +
            # kmeans.predict that sets global_cluster) is host-side sklearn glue
            # with no Pallas equivalent; GLOBAL_CLUSTER is assumed set externally.
            return y

        # reduced path: keep only the activated OUTPUT neurons for this cluster
        cluster = GLOBAL_CLUSTER
        if (not self.weight_updated) or (self._filtered_cluster != cluster):
            activated = self.act_list[cluster]
            # contiguous row gather on the row-major (N, K) weight — DMA-friendly glue
            fw = jnp.take(self.weight, activated, axis=0)
            fb = jnp.take(self.bias, activated, axis=0)
            # one-time transpose / pad / cast for the filtered weights too
            self._filtered_params = LinearParams(fw, fb)
            self._filtered_cluster = cluster
            self.weight_updated = True
        return pallas_linear(x, self._filtered_params)


if __name__ == "__main__":
    key = jax.random.PRNGKey(0)
    k_w, k_b, k_x, k_xs, k_perm = jax.random.split(key, 5)

    out_features = 32
    in_features = 64
    sparsity = 0.5
    num_clusters = 4
    tokens = 8

    weight = jax.random.normal(k_w, (out_features, in_features), dtype=jnp.float32) * 0.05
    bias = jax.random.normal(k_b, (out_features,), dtype=jnp.float32) * 0.05

    remained = int(out_features * sparsity)
    # deterministic per-cluster activated-neuron orderings (permutations of output neurons)
    act_list = [
        jax.random.permutation(jax.random.fold_in(k_perm, c), out_features)
        for c in range(num_clusters)
    ]

    layer = ReduceLayer(weight, bias, act_list, sparsity)

    # --- dense path (batch > 1) ---
    x_dense = jax.random.normal(k_x, (tokens, in_features), dtype=jnp.float32)
    y_dense = jax.block_until_ready(layer(x_dense))
    ref_dense = x_dense @ weight.T + bias
    assert y_dense.shape == (tokens, out_features)
    assert jnp.allclose(y_dense, ref_dense, atol=1e-4, rtol=1e-4)

    # --- sparse / reduced path (batch == 1) ---
    x_sparse = jax.random.normal(k_xs, (1, in_features), dtype=jnp.float32)
    y_sparse = jax.block_until_ready(layer(x_sparse))
    activated = act_list[GLOBAL_CLUSTER][:remained]
    ref_sparse = x_sparse @ weight[activated, :].T + bias[activated]
    assert y_sparse.shape == (1, remained)
    assert jnp.allclose(y_sparse, ref_sparse, atol=1e-4, rtol=1e-4)

    print("KERNEL_OK")
</pallas_src>

<mosaic_0001>
module attributes {stable_mosaic.version = 11 : i64} {
  func.func @_linear_kernel_single(%arg0: i32, %arg1: i32, %arg2: memref<8x64xf32, #tpu.memory_space<vmem>>, %arg3: memref<64x32xf32, #tpu.memory_space<vmem>>, %arg4: memref<1x32xf32, #tpu.memory_space<vmem>>, %arg5: memref<8x32xf32, #tpu.memory_space<vmem>>) attributes {dimension_semantics = [#tpu.dimension_semantics<parallel>, #tpu.dimension_semantics<parallel>], iteration_bounds = array<i64: 1, 1>, scalar_prefetch = 0 : i64, scratch_operands = 0 : i64, tpu.core_type = #tpu.core_type<tc>, window_params = [{transform_indices = @transform_0, window_bounds = array<i64: 8, 64>}, {transform_indices = @transform_1, window_bounds = array<i64: 64, 32>}, {transform_indices = @transform_2, window_bounds = array<i64: 1, 32>}, {transform_indices = @transform_3, window_bounds = array<i64: 8, 32>}]} {
    %c0 = arith.constant 0 : index
    %c0_0 = arith.constant 0 : index
    %0 = vector.load %arg2[%c0, %c0_0] : memref<8x64xf32, #tpu.memory_space<vmem>>, vector<8x64xf32>
    %c0_1 = arith.constant 0 : index
    %c0_2 = arith.constant 0 : index
    %1 = vector.load %arg3[%c0_1, %c0_2] : memref<64x32xf32, #tpu.memory_space<vmem>>, vector<64x32xf32>
    %cst = arith.constant dense<0.000000e+00> : vector<8x32xf32>
    %2 = tpu.matmul %0, %1, %cst {dimension_numbers = #tpu.dot_dimension_numbers<[1], [0], [0], [1], [0, 0, 1, 1], [], []>} : vector<8x64xf32>, vector<64x32xf32>, vector<8x32xf32> -> vector<8x32xf32>
    %c0_3 = arith.constant 0 : index
    %c0_4 = arith.constant 0 : index
    %3 = vector.load %arg4[%c0_3, %c0_4] : memref<1x32xf32, #tpu.memory_space<vmem>>, vector<1x32xf32>
    %4 = vector.broadcast %3 : vector<1x32xf32> to vector<8x32xf32>
    %5 = arith.addf %2, %4 : vector<8x32xf32>
    %c0_5 = arith.constant 0 : index
    %c0_6 = arith.constant 0 : index
    %6 = vector.load %arg5[%c0_5, %c0_6] : memref<8x32xf32, #tpu.memory_space<vmem>>, vector<8x32xf32>
    tpu.vector_store %arg5[%c0_5, %c0_6], %5 {strides = array<i32>} : memref<8x32xf32, #tpu.memory_space<vmem>>, vector<8x32xf32>,
    return
  }
  func.func @transform_0(%arg0: i32, %arg1: i32) -> (i32, i32) {
    %c0_i32 = arith.constant 0 : i32
    %c0_i32_0 = arith.constant 0 : i32
    return %arg0, %c0_i32 : i32, i32
  }
  func.func @transform_1(%arg0: i32, %arg1: i32) -> (i32, i32) {
    %c0_i32 = arith.constant 0 : i32
    %c0_i32_0 = arith.constant 0 : i32
    return %c0_i32, %arg1 : i32, i32
  }
  func.func @transform_2(%arg0: i32, %arg1: i32) -> (i32, i32) {
    %c0_i32 = arith.constant 0 : i32
    %c0_i32_0 = arith.constant 0 : i32
    return %c0_i32, %arg1 : i32, i32
  }
  func.func @transform_3(%arg0: i32, %arg1: i32) -> (i32, i32) {
    %c0_i32 = arith.constant 0 : i32
    return %arg0, %arg1 : i32, i32
  }
}

</mosaic_0001>

<bundles_post_ra>
// kernel: tpu_custom_call.1
= control target key start
LH: loop header
LB: loop body
LE: loop exit
PB: predicated region body
PF: predicated region fallthrough
CT: control target
= control target key end

     0   :  { %v191_v3 = vmov 0.0|0.0   ;;  %vm192_vm0 = vmmov 0   ;;  %v193_v6 = vmov 0.0   ;;  %s257_s0 = inlined_call_operand.vmem [shape: f32[8,64], index: 0, kind: input, shape index: {}]   ;;  %s258_s1 = inlined_call_operand.vmem [shape: f32[64,32], index: 1, kind: input, shape index: {}]   ;;  %s259_s2 = inlined_call_operand.vmem [shape: f32[1,32], index: 2, kind: input, shape index: {}]   ;;  %s260_s3 = inlined_call_operand.hbm [shape: f32[8,32], index: 3, kind: output, shape index: {}]  }
   0x1   :  { %v16_v0 = vld [vmem:[%s258_s1] sm:$0xff]  ;;  %v17_v1 = vld [vmem:[%s258_s1 + $0x8] sm:$0xff]  ;;  %v18_v2 = vld [vmem:[%s258_s1 + $0x10] sm:$0xff]  ;;  %151 = vmatprep.subr.bf16.mxu0 %v191_v3  ;;  %148 = vmatprep.mubr.msk.f32.mxu0 %vm192_vm0, %v193_v6 }
   0x2   :  { %v152_v4 = vpack.c.bf16 %v17_v1, %v16_v0  ;;  %v19_v5 = vld [vmem:[%s258_s1 + $0x18] sm:$0xff] }
   0x3   :  { %v155_v7 = vpack.c.bf16 %v19_v5, %v18_v2 }
   0x4   :  { %153 = vmatpush3.bf16.msra.mxu0 %v152_v4 }
   0x5   :  { %8 = vsyncpa [#allocation3], 0  ;;  %154 = vmatprep.subr.bf16.mxu0 %v191_v3  ;;  %v20_v8 = vld [vmem:[%s258_s1 + $0x20] sm:$0xff]  ;;  %v21_v9 = vld [vmem:[%s258_s1 + $0x28] sm:$0xff]  ;;  %vm31_vm1 = vcmask 523264   ;;  %s194_s5 = smov [#allocation2]  }
   0x6   :  { %v158_v10 = vpack.c.bf16 %v21_v9, %v20_v8  ;;  %v22_v11 = vld [vmem:[%s258_s1 + $0x30] sm:$0xff]  ;;  %v23_v12 = vld [vmem:[%s258_s1 + $0x38] sm:$0xff]  ;;  %v15_v14 = vld [vmem:[%s257_s0] sm:$0xff]  ;;  %s113_s6 = sshll.u32 %s194_s5, 4  ;;  %vm105_vm2 = vcmask 261120   ;;  %s114_s6 = int_to_ptr.vmem [resolvable:$true] %s113_s6 }
   0x7   :  { %v161_v13 = vpack.c.bf16 %v23_v12, %v22_v11  ;;  %v121_v15 = vld [vmem:[%s259_s2] ss:$0 sm:$0xff]  ;;  %s167_s1 = scalar_lea.vmem %s114_s6, 128  ;;  %p172_p1 = scmp.lt.s32.totalorder %s114_s6, %s114_s6 }
   0x8   :  { %156 = vmatpush3.bf16.msra.mxu0 %v155_v7  ;;  %p168_p0 = scmp.ne.s32.totalorder %s114_s6, %s167_s1  ;;  %p173_p2 = scmp.lt.s32.totalorder %s167_s1, %s167_s1 }
   0x9   :  { %157 = vmatprep.subr.bf16.mxu0 %v191_v3 }
   0xa   :  { %p174_p3 = por %p173_p2, %p172_p1 }
   0xc   :  { %159 = vmatpush3.bf16.msra.mxu0 %v158_v10  ;;  %p175_p4 = pnand %p174_p3, %p168_p0 }
   0xd   :  { %160 = vmatprep.subr.bf16.mxu0 %v191_v3 }
  0x10   :  { %162 = vmatpush3.bf16.msra.mxu0 %v161_v13 }
  0x13   :  { %149 = vmatmul.mubr.msk.f32.vlgmr.msra.gmra.mrb[0].mxu0 %vm31_vm1, %v15_v14 }
  0xe6   :  { %v101_v16 = vpop.f32.mrb[0].mxu0 }
  0xe7   :  { %v102_v17 = vadd.f32 %v121_v15, %v101_v16  ;;  %v150_v18 = vpop.f32.mrb[1].mxu0 }
  0xe9   :  { %106 = vst.msk [vmem:[#allocation2] sm:$0xff] %vm105_vm2, %v102_v17 }
  0xea   :  { %178 = shalt.err (!%p175_p4)
}
  0xeb   :  { %s179_s8 = scalar_lea.hbm %s260_s3, 128 }
  0xec   :  { %p180_p5 = scmp.ne.s32.totalorder %s260_s3, %s179_s8  ;;  %p183_p6 = scmp.lt.u32.totalorder %s179_s8, %s260_s3 }
  0xee   :  { %p185_p7 = pnand %p183_p6, %p180_p5 }
  0xf0   :  { %188 = shalt.err (!%p185_p7)
}
  0xf1   :  { %116 = dma.vmem_to_hbm [thread:$0]  %s114_s6, 128, %s260_s3, [#allocation3]  }
  0xf2   :  { %189 = dma.done.wait [#allocation3], 128  }
  0xf3   :  { %190 = vsyncadd [#allocation3], 4294967168 }
  0xf4   :  { %120 = vsyncpa [#allocation3], 1 }

</bundles_post_ra>
